<compile_context>
chip_gen: v7x
topology: tpu7x:2x2x1
jax: 0.10.0
libtpu: 0.0.40
codegen_flags: <defaults>
</compile_context>

<pallas_src>
import statistics

import numpy as np
import jax
import jax.numpy as jnp
from jax.experimental import pallas as pl
from jax.experimental.pallas import tpu as pltpu

N_BITS = 8
N_LEVELS = 2 ** N_BITS
MAX_ITERS = 10
CONFIDENCE_LEVEL = 0.99


# ---------------------------------------------------------------------------
# Host-side calibration: port of BERTCONFActQuantizer.init_quantization_scale
# (channel_wise=False).  Runs once; produces the module's parameters.
# ---------------------------------------------------------------------------
def init_quantization_scale(x_np, n_levels=N_LEVELS, max_iters=MAX_ITERS,
                            confidence_level=CONFIDENCE_LEVEL):
    x_clone = np.asarray(x_np, dtype=np.float32).copy()
    thresholds, deltas, zero_points = [], [], []
    # stats.norm.interval(cl, loc, scale)[1] == loc + scale * Phi^-1(0.5 + cl/2)
    z = statistics.NormalDist().inv_cdf(0.5 + confidence_level / 2.0)
    for _ in range(max_iters):
        non_zero = x_clone[x_clone != 0]
        if non_zero.size == 0:
            break
        abs_nz = np.abs(non_zero)
        mean_val = float(abs_nz.mean(dtype=np.float64))
        if abs_nz.size > 1:
            std_val = float(abs_nz.std(ddof=1, dtype=np.float64))  # torch.std() is unbiased
        else:
            std_val = float("nan")  # torch.std() of a single element is NaN
        threshold = mean_val + z * std_val  # ci_upper
        thresholds.append(threshold)
        outliers = np.abs(x_clone) > threshold
        # TODO(synk): outlier_values / outlier_counts bookkeeping is not used by
        # the forward pass; skipped.
        inliers = x_clone[~outliers]
        if inliers.size >= x_clone.size:
            break
        x_min = float(inliers.min())
        x_max = float(inliers.max())
        delta = (x_max - x_min) / (n_levels - 1)
        zero_point = float(np.round(-x_min / delta))
        deltas.append(delta)
        zero_points.append(zero_point)
        x_clone[~outliers] = 0.0
    while len(deltas) < len(thresholds):
        if not deltas:
            # Degenerate calibration (no outliers on the very first pass): the
            # reference torch module would raise IndexError here; map the
            # unmatched group to delta=0 (output 0) so forward stays defined.
            deltas.append(0.0)
            zero_points.append(0.0)
        else:
            deltas.append(deltas[-1])
            zero_points.append(zero_points[-1])
    # Bake parameters as float32 so kernel and reference agree bit-exactly.
    thresholds = [float(np.float32(t)) for t in thresholds]
    deltas = [float(np.float32(d)) for d in deltas]
    zero_points = [float(np.float32(zp)) for zp in zero_points]
    return thresholds, deltas, zero_points


def _safe_inv(delta):
    # Guards a degenerate delta == 0 calibration (output is 0 either way since
    # the final multiply is by delta == 0).
    return 0.0 if delta == 0.0 else float(np.float32(1.0) / np.float32(delta))


# ---------------------------------------------------------------------------
# Pallas kernel: fused group-select + fake quant/dequant (one vector pass).
# ---------------------------------------------------------------------------
def make_quant_kernel(thresholds, deltas, zero_points, n_levels=N_LEVELS,
                      approx_recip=True):
    n = len(thresholds)
    assert n >= 1 and len(deltas) == n and len(zero_points) == n
    inv_deltas = [_safe_inv(d) for d in deltas]
    # For very few groups the saved where-chain doesn't pay for the EUP
    # reciprocal + zero-delta guard; stay on the exact path.
    approx_recip = approx_recip and n >= 3

    # Sort thresholds ascending; NaN (never satisfied by |x| <= t) sorts first
    # so the satisfied-threshold set is always a suffix of the sorted order and
    # the nested where-chain below reproduces cnt = sum_i (|x| <= t_i) exactly.
    order = sorted(range(n),
                   key=lambda i: -np.inf if np.isnan(thresholds[i]) else thresholds[i])
    s_thr = [thresholds[i] for i in order]

    # Per-group constants; group g == n (|x| below every threshold) is never
    # quantized by the torch loop -> delta = inv = 0 makes the output exactly 0.
    def params(g):
        if g >= n:
            return 0.0, 0.0, 0.0
        return inv_deltas[g], deltas[g], -zero_points[g]

    hi_off = float(n_levels - 1)

    def kernel(x_ref, o_ref):
        x = x_ref[...].astype(jnp.float32)   # single up-cast (cheap on v5e too)
        # TODO(synk): an optional bf16 compare/select fast path (v6e/v7x) would
        # halve VALU bundles for bf16 inputs at the cost of ULP-level group
        # flips; not implemented here.
        x_abs = jnp.abs(x)
        # Start from group 0 (|x| above all thresholds); walk thresholds from
        # largest to smallest -- the innermost satisfied one wins, which equals
        # the count-based group index of the reference module.
        inv0, d0, lo0 = params(0)
        d_e = jnp.float32(d0)
        lo_e = jnp.float32(lo0)
        if approx_recip:
            # VALU-reduced path: only two where-chains (delta, -zp); 1/delta is
            # produced on the EUP (free slot) after the selects.
            for j in range(n - 1, -1, -1):
                g = n - j
                _, d_g, lo_g = params(g)
                m = x_abs <= jnp.float32(s_thr[j])
                d_e = jnp.where(m, jnp.float32(d_g), d_e)
                lo_e = jnp.where(m, jnp.float32(lo_g), lo_e)
            inv_e = pl.reciprocal(d_e, approx=True)
            q = jnp.clip(jnp.round(x * inv_e), lo_e, lo_e + jnp.float32(hi_off))
            out = q * d_e
            # delta == 0 ("never quantized" group, or degenerate calibration):
            # 1/0 -> inf/NaN upstream; force the exact 0 the reference produces.
            out = jnp.where(d_e == jnp.float32(0.0), jnp.float32(0.0), out)
        else:
            # Bit-exact path: host-precomputed f32 reciprocal per group.
            inv_e = jnp.float32(inv0)
            for j in range(n - 1, -1, -1):
                g = n - j
                inv_g, d_g, lo_g = params(g)
                m = x_abs <= jnp.float32(s_thr[j])
                inv_e = jnp.where(m, jnp.float32(inv_g), inv_e)
                d_e = jnp.where(m, jnp.float32(d_g), d_e)
                lo_e = jnp.where(m, jnp.float32(lo_g), lo_e)
            # (clip(round(x/d)+zp, 0, L-1) - zp) * d == clip(round(x/d), -zp, L-1-zp) * d
            q = jnp.clip(jnp.round(x * inv_e), lo_e, lo_e + jnp.float32(hi_off))
            out = q * d_e
        o_ref[...] = out.astype(o_ref.dtype)

    return kernel


def _round_up(a, b):
    return ((a + b - 1) // b) * b


def conf_act_quantize(x, thresholds, deltas, zero_points, n_levels=N_LEVELS,
                      approx_recip=True, max_block_elems=512 * 1024):
    """Forward pass of an inited BERTCONFActQuantizer (channel_wise=False)."""
    x = jnp.asarray(x)
    orig_shape = x.shape
    orig_dtype = x.dtype
    total = int(np.prod(orig_shape)) if len(orig_shape) else 1

    # Empty calibration (all-zero calibration tensor) or empty input: the torch
    # forward leaves x_dequant at zeros.
    if len(thresholds) == 0 or total == 0:
        return jnp.zeros(orig_shape, orig_dtype)

    # Lane-dense repacking with NO extra HBM passes: pick the largest lane in
    # {2048..128} that divides the flat size, so the (rows, lane) reshape is a
    # pure metadata change (no pad, no output slice) and stores are unmasked.
    lane = None
    for cand in (2048, 1024, 512, 256, 128):
        if total % cand == 0:
            lane = cand
            break
    pad = 0
    if lane is None:
        if total < 128:
            lane = total                      # tiny array: one full-dim block
        else:
            # TODO(synk): rare ragged case (flat size not a multiple of 128):
            # fall back to one flat pad copy; typical BERT activation sizes
            # (hidden a multiple of 128) never hit this path.
            lane = 128
            pad = _round_up(total, lane) - total

    x_flat = x.reshape(-1)
    if pad:
        x_flat = jnp.pad(x_flat, (0, pad))
    rows = (total + pad) // lane
    x2d = x_flat.reshape(rows, lane)

    # Row tiling: keep blocks <= ~2 MiB f32 per buffer (safe for the default
    # scoped-VMEM limit on v5e/v6e/v7x with double-buffered in+out), and make
    # sure the grid has >= 2 steps whenever possible so both of v7x's
    # TensorCores get work.  A partial final block is handled by Pallas'
    # masking (no host-side padding of rows needed).
    if rows <= 8:
        tm = rows                             # full-extent block, grid of 1
    else:
        cap = max(8, (max_block_elems // lane) // 8 * 8)
        tm = min(cap, _round_up(pl.cdiv(rows, 2), 8))
    grid = pl.cdiv(rows, tm)

    kernel = make_quant_kernel(thresholds, deltas, zero_points, n_levels,
                               approx_recip=approx_recip)

    out2d = pl.pallas_call(
        kernel,
        out_shape=jax.ShapeDtypeStruct((rows, lane), orig_dtype),
        grid=(grid,),
        # (On a mem-bound v5e, pipeline_mode=pl.Buffered(3) on the input spec
        # can hide exposed DMA between steps; left at the default depth here.)
        in_specs=[pl.BlockSpec((tm, lane), lambda i: (i, 0))],
        out_specs=pl.BlockSpec((tm, lane), lambda i: (i, 0)),
        compiler_params=pltpu.CompilerParams(
            dimension_semantics=("parallel",)),  # shards rows across v7x's 2 TCs
    )(x2d)

    out = out2d.reshape(-1)
    if pad:
        out = out[:total]
    return out.reshape(orig_shape)


# ---------------------------------------------------------------------------
# Independent numpy reference of the torch forward (count-based group index),
# using the same f32 constants / reciprocal as the exact kernel path.
# ---------------------------------------------------------------------------
def reference_forward(x_np, thresholds, deltas, zero_points, n_levels=N_LEVELS):
    x = np.asarray(x_np, dtype=np.float32)
    x_abs = np.abs(x)
    n = len(thresholds)
    cnt = np.zeros(x.shape, dtype=np.int64)
    for t in thresholds:
        cnt += (x_abs <= np.float32(t)).astype(np.int64)
    out = np.zeros_like(x)
    for g in range(n):
        mask = cnt == g
        if not mask.any():
            continue
        delta = np.float32(deltas[g])
        zp = np.float32(zero_points[g])
        inv = np.float32(_safe_inv(float(delta)))
        x_int = np.round(x[mask] * inv) + zp
        x_q = np.clip(x_int, 0, n_levels - 1)
        out[mask] = (x_q - zp) * delta
    return out


if __name__ == "__main__":
    key = jax.random.PRNGKey(0)
    # BERT-style activations: (batch=2, seq=8, hidden=32)
    x = jax.random.normal(key, (2, 8, 32), dtype=jnp.float32) * 2.0
    x_np = np.asarray(x)

    # One-time calibration (== the first forward call of the un-inited module).
    thresholds, deltas, zero_points = init_quantization_scale(x_np)
    y_ref = reference_forward(x_np, thresholds, deltas, zero_points)

    # 1) Exact path: bit-exact vs the count-based reference.
    y_exact = jax.block_until_ready(
        conf_act_quantize(x, thresholds, deltas, zero_points, approx_recip=False))
    np.testing.assert_allclose(np.asarray(y_exact), y_ref, atol=1e-5, rtol=1e-5)

    # 2) Default fast path (EUP approx reciprocal): the group selection is
    #    identical, so each element matches the reference up to at most one
    #    quantization step (an ULP-level rounding-boundary flip) and is never
    #    NaN/inf (delta == 0 group guarded).
    y_fast = jax.block_until_ready(
        conf_act_quantize(x, thresholds, deltas, zero_points))
    y_fast_np = np.asarray(y_fast)
    assert np.isfinite(y_fast_np).all(), "fast path produced non-finite values"
    step = max(abs(float(d)) for d in deltas) if deltas else 0.0
    assert float(np.max(np.abs(y_fast_np - y_ref))) <= step * 1.001 + 1e-4, \
        "fast path deviates by more than one quantization step"

    print("KERNEL_OK")
</pallas_src>

<mosaic_0001>
module attributes {stable_mosaic.version = 11 : i64} {
  func.func @kernel(%arg0: i32, %arg1: memref<1x512xf32, #tpu.memory_space<vmem>>, %arg2: memref<1x512xf32, #tpu.memory_space<vmem>>) attributes {dimension_semantics = [#tpu.dimension_semantics<parallel>], iteration_bounds = array<i64: 1>, scalar_prefetch = 0 : i64, scratch_operands = 0 : i64, tpu.core_type = #tpu.core_type<tc>, window_params = [{transform_indices = @transform_0, window_bounds = array<i64: 1, 512>}, {transform_indices = @transform_1, window_bounds = array<i64: 1, 512>}]} {
    %c0 = arith.constant 0 : index
    %c0_0 = arith.constant 0 : index
    %0 = vector.load %arg1[%c0, %c0_0] : memref<1x512xf32, #tpu.memory_space<vmem>>, vector<1x512xf32>
    %1 = math.absf %0 : vector<1x512xf32>
    %cst = arith.constant 7.01143741 : f32
    %2 = vector.broadcast %cst : f32 to vector<1x512xf32>
    %3 = arith.cmpf ole, %1, %2 : vector<1x512xf32>
    %cst_1 = arith.constant 27.8351612 : f32
    %cst_2 = arith.constant 27.8351612 : f32
    %4 = vector.broadcast %cst_1 : f32 to vector<1x512xf32>
    %5 = vector.broadcast %cst_2 : f32 to vector<1x512xf32>
    %6 = arith.select %3, %4, %5 : vector<1x512xi1>, vector<1x512xf32>
    %cst_3 = arith.constant 0.0359257832 : f32
    %cst_4 = arith.constant 0.0359257832 : f32
    %7 = vector.broadcast %cst_3 : f32 to vector<1x512xf32>
    %8 = vector.broadcast %cst_4 : f32 to vector<1x512xf32>
    %9 = arith.select %3, %7, %8 : vector<1x512xi1>, vector<1x512xf32>
    %cst_5 = arith.constant -1.290000e+02 : f32
    %cst_6 = arith.constant -1.290000e+02 : f32
    %10 = vector.broadcast %cst_5 : f32 to vector<1x512xf32>
    %11 = vector.broadcast %cst_6 : f32 to vector<1x512xf32>
    %12 = arith.select %3, %10, %11 : vector<1x512xi1>, vector<1x512xf32>
    %cst_7 = arith.constant 4.62231922 : f32
    %13 = vector.broadcast %cst_7 : f32 to vector<1x512xf32>
    %14 = arith.cmpf ole, %1, %13 : vector<1x512xf32>
    %cst_8 = arith.constant 0.000000e+00 : f32
    %15 = vector.broadcast %cst_8 : f32 to vector<1x512xf32>
    %16 = arith.select %14, %15, %6 : vector<1x512xi1>, vector<1x512xf32>
    %cst_9 = arith.constant 0.000000e+00 : f32
    %17 = vector.broadcast %cst_9 : f32 to vector<1x512xf32>
    %18 = arith.select %14, %17, %9 : vector<1x512xi1>, vector<1x512xf32>
    %cst_10 = arith.constant 0.000000e+00 : f32
    %19 = vector.broadcast %cst_10 : f32 to vector<1x512xf32>
    %20 = arith.select %14, %19, %12 : vector<1x512xi1>, vector<1x512xf32>
    %21 = arith.mulf %0, %16 : vector<1x512xf32>
    %22 = math.roundeven %21 : vector<1x512xf32>
    %cst_11 = arith.constant 2.550000e+02 : f32
    %23 = vector.broadcast %cst_11 : f32 to vector<1x512xf32>
    %24 = arith.addf %20, %23 : vector<1x512xf32>
    %25 = arith.maximumf %20, %22 : vector<1x512xf32>
    %26 = arith.minimumf %24, %25 : vector<1x512xf32>
    %27 = arith.mulf %26, %18 : vector<1x512xf32>
    %c0_12 = arith.constant 0 : index
    %c0_13 = arith.constant 0 : index
    %28 = vector.load %arg2[%c0_12, %c0_13] : memref<1x512xf32, #tpu.memory_space<vmem>>, vector<1x512xf32>
    tpu.vector_store %arg2[%c0_12, %c0_13], %27 {strides = array<i32>} : memref<1x512xf32, #tpu.memory_space<vmem>>, vector<1x512xf32>,
    return
  }
  func.func @transform_0(%arg0: i32) -> (i32, i32) {
    %c0_i32 = arith.constant 0 : i32
    %c0_i32_0 = arith.constant 0 : i32
    return %arg0, %c0_i32 : i32, i32
  }
  func.func @transform_1(%arg0: i32) -> (i32, i32) {
    %c0_i32 = arith.constant 0 : i32
    %c0_i32_0 = arith.constant 0 : i32
    return %arg0, %c0_i32 : i32, i32
  }
}

</mosaic_0001>

<bundles_post_ra>
// kernel: tpu_custom_call.1
= control target key start
LH: loop header
LB: loop body
LE: loop exit
PB: predicated region body
PF: predicated region fallthrough
CT: control target
= control target key end

     0   :  { %6 = vsyncpa [#allocation3], 0  ;;  %s146_s0 = inlined_call_operand.hbm [shape: f32[1,512], index: 0, kind: input, shape index: {}]   ;;  %s147_s1 = inlined_call_operand.hbm [shape: f32[1,512], index: 1, kind: output, shape index: {}]  }
   0x1   :  { %7 = vsyncpa [#allocation4], 0  ;;  %s107_s6 = smov [#allocation2]   ;;  %s59_s10 = scalar_lea.hbm %s146_s0, 64 }
   0x2   :  { %s14_s7 = sshll.u32 %s107_s6, 4  ;;  %p60_p0 = scmp.ne.s32.totalorder %s146_s0, %s59_s10  ;;  %s15_s7 = int_to_ptr.vmem [resolvable:$true] %s14_s7 }
   0x3   :  { %p63_p1 = scmp.lt.u32.totalorder %s59_s10, %s146_s0 }
   0x5   :  { %p65_p2 = pnand %p63_p1, %p60_p0 }
   0x7   :  { %68 = shalt.err (!%p65_p2)
}
   0x8   :  { %s69_s15 = scalar_lea.vmem %s15_s7, 64  ;;  %p74_p4 = scmp.lt.s32.totalorder %s15_s7, %s15_s7 }
   0x9   :  { %p70_p3 = scmp.ne.s32.totalorder %s15_s7, %s69_s15  ;;  %p75_p5 = scmp.lt.s32.totalorder %s69_s15, %s69_s15 }
   0xb   :  { %p76_p6 = por %p75_p5, %p74_p4 }
   0xd   :  { %p77_p7 = pnand %p76_p6, %p70_p3 }
   0xf   :  { %80 = shalt.err (!%p77_p7)
}
  0x10   :  { %17 = dma.hbm_to_vmem [thread:$0]  %s146_s0, 64, %s15_s7, [#allocation3]  }
  0x11   :  { %103 = dma.done.wait [#allocation3], 64  }
  0x12   :  { %104 = vsyncadd [#allocation3], 4294967232  ;;  %v21_v0 = vld [vmem:[#allocation2] sm:$0xf]  ;;  %v108_v2 = vmov 27.835161   ;;  %v33_v9 = vlaneseq }
  0x13   :  { %v22_v1 = vand.u32 2147483647, %v21_v0  ;;  %v109_v4 = vmov -129.0   ;;  %v110_v11 = vmov 0.035925783   ;;  %s111_s18 = smov [#allocation5]  }
  0x14   :  { %s44_s19 = sshll.u32 %s111_s18, 4  ;;  %vm35_vm1 = vcmp.lt.s32.totalorder %v33_v9, 512  ;;  %s45_s19 = int_to_ptr.vmem [resolvable:$true] %s44_s19 }
  0x15   :  { %vm23_vm0 = vcmp.le.f32.partialorder %v22_v1, 4.622319  ;;  %s81_s0 = scalar_lea.vmem %s45_s19, 64  ;;  %p86_p9 = scmp.lt.s32.totalorder %s45_s19, %s45_s19 }
  0x16   :  { %v24_v3 = vsel %vm23_vm0, 0.0, %v108_v2  ;;  %v26_v5 = vsel %vm23_vm0, 0.0, %v109_v4  ;;  %v25_v12 = vsel %vm23_vm0, 0.0, %v110_v11  ;;  %p82_p8 = scmp.ne.s32.totalorder %s45_s19, %s81_s0  ;;  %p87_p10 = scmp.lt.s32.totalorder %s81_s0, %s81_s0 }
  0x17   :  { %v27_v6 = vmul.f32 %v24_v3, %v21_v0  ;;  %v29_v8 = vadd.f32 255.0, %v26_v5 }
  0x18   :  { %p88_p11 = por %p87_p10, %p86_p9 }
  0x19   :  { %v53_v7 = vround.rtne.f32 %v27_v6 }
  0x1a   :  { %p89_p12 = pnand %p88_p11, %p82_p8 }
  0x1b   :  { %v30_v10 = vmax.f32 %v26_v5, %v53_v7 }
  0x1d   :  { %v31_v13 = vmin.f32 %v29_v8, %v30_v10 }
  0x1f   :  { %v32_v14 = vmul.f32 %v31_v13, %v25_v12 }
  0x21   :  { %37 = vst.msk [vmem:[#allocation5] sm:$0xf] %vm35_vm1, %v32_v14 }
  0x22   :  { %92 = shalt.err (!%p89_p12)
}
  0x23   :  { %s93_s22 = scalar_lea.hbm %s147_s1, 64 }
  0x24   :  { %p94_p13 = scmp.ne.s32.totalorder %s147_s1, %s93_s22  ;;  %p97_p0 = scmp.lt.u32.totalorder %s93_s22, %s147_s1 }
  0x26   :  { %p99_p1 = pnand %p97_p0, %p94_p13 }
  0x28   :  { %102 = shalt.err (!%p99_p1)
}
  0x29   :  { %47 = dma.vmem_to_hbm [thread:$0]  %s45_s19, 64, %s147_s1, [#allocation4]  }
  0x2a   :  { %105 = dma.done.wait [#allocation4], 64  }
  0x2b   :  { %106 = vsyncadd [#allocation4], 4294967232 }
  0x2c   :  { %51 = vsyncpa [#allocation3], 1 }
  0x2d   :  { %52 = vsyncpa [#allocation4], 1 }

</bundles_post_ra>
